<compile_context>
chip_gen: v5e
topology: v5e:2x2
jax: 0.10.0
libtpu: 0.0.40
codegen_flags: <defaults>
</compile_context>

<pallas_src>
import functools

import jax
import jax.numpy as jnp
from jax.experimental import pallas as pl
from jax.experimental.pallas import tpu as pltpu


def _elm_loss_kernel(x_ref, tgt_ref, m_ref, out_ref, *, s, lamda, n_valid, tile_b):
    # Load native-dtype tile, upcast in-kernel (HBM traffic stays at native width).
    x = x_ref[...].astype(jnp.float32)          # (TB, C)
    tgt = tgt_ref[...]                          # (TB, 1) int32
    m = m_ref[...].astype(jnp.float32)          # (1,  C)
    TB, C = x.shape

    # class-index iota along the lane axis
    ids = jax.lax.broadcasted_iota(jnp.int32, (TB, C), 1)

    # one-hot of the target class (torch scatter_ on dim=1)
    index = ids == tgt                          # (TB, C) bool

    # runner-up class: argmax over non-target logits (first-occurrence tie-break)
    x_masked = jnp.where(index, -jnp.inf, x)                              # -inf sentinel
    max_val = jnp.max(x_masked, axis=1, keepdims=True)                    # reduction 1
    first_idx = jnp.min(
        jnp.where(x_masked == max_val, ids, jnp.int32(C)), axis=1, keepdims=True
    )                                                                     # reduction 2
    index2 = ids == first_idx                   # one-hot of runner-up class

    # fused target logit: s * (x_t - m1 + lamda*m2) in ONE masked row-sum
    tgt_logit = s * jnp.sum(
        jnp.where(index, x - m, 0.0) + jnp.where(index2, lamda * m, 0.0),
        axis=1,
        keepdims=True,
    )                                                                     # reduction 3

    # analytic row max of the adjusted logits: non-target columns are s*x (max = s*max_val),
    # the target column equals tgt_logit — no reduction over `logits` needed.
    zmax = jnp.maximum(s * max_val, tgt_logit)                            # (TB, 1)

    # logits-free LSE: mask the target column's EXPONENT to -inf (do not subtract),
    # then add the per-row scalar exp(tgt_logit - zmax).
    p = jnp.exp(jnp.where(index, -jnp.inf, s * x - zmax))                 # (TB, C)
    sum_exp = jnp.sum(p, axis=1, keepdims=True) + jnp.exp(tgt_logit - zmax)  # reduction 4
    lse = jnp.log(sum_exp) + zmax

    loss_i = lse - tgt_logit                                              # (TB, 1)

    # mask padded/garbage batch rows out of the partial sum (select, NaN/Inf safe)
    row = pl.program_id(0) * tile_b + jax.lax.broadcasted_iota(jnp.int32, (TB, 1), 0)
    loss_i = jnp.where(row < n_valid, loss_i, 0.0)

    # lane-dense partial-sum output block for this tile (unmasked (8,128) store)
    out_ref[...] = jnp.zeros(out_ref.shape, jnp.float32) + jnp.sum(loss_i)


def _sublane_multiple(itemsize):
    if itemsize >= 4:
        return 8
    if itemsize == 2:
        return 16
    return 32


def _vmem_budget_bytes():
    """Derive a safe scoped-VMEM budget from the hardware (cap ~48 MiB on v7x's
    64 MiB parts, ~96 MiB on v5e/v6e's 128 MiB parts)."""
    cap = 128 * 1024 * 1024
    try:
        info = pltpu.get_tpu_info()
        cap = int(getattr(info, "vmem_capacity_bytes", cap))
    except Exception:
        pass
    return int(min(96 * 1024 * 1024, (cap * 3) // 4))


def _choose_tile_b(B, C, itemsize, vmem_budget, sub_mult):
    """Pick a batch tile: sized against ~6 live (TB,C) f32 temporaries plus the
    double-buffered native input block, rounded to the dtype sublane packing,
    and kept splittable into >= 2 grid steps when B allows (v7x has 2 TCs)."""
    per_row = C * (6 * 4 + 2 * itemsize)
    tb = vmem_budget // (2 * max(per_row, 1))       # use at most ~half the budget
    tb = max(sub_mult, min(tb, 2048))
    b_up = -(-B // sub_mult) * sub_mult
    if B >= 2 * sub_mult:
        half = -(-B // 2)
        half_up = -(-half // sub_mult) * sub_mult
        tb = min(tb, half_up)
    tb = min(tb, b_up)
    return max(sub_mult, (tb // sub_mult) * sub_mult)


def elm_loss(x, target, m_list, *, s=30.0, lamda=1.0, tile_b=None):
    """x: (B, C) logits (any float dtype), target: (B,) int, m_list: (C,) float.
    Returns the scalar mean ELM loss."""
    B, C = x.shape
    itemsize = jnp.dtype(x.dtype).itemsize
    sub_mult = _sublane_multiple(itemsize)
    vmem_budget = _vmem_budget_bytes()
    if tile_b is None:
        tile_b = _choose_tile_b(B, C, itemsize, vmem_budget, sub_mult)

    num_tiles = -(-B // tile_b)

    # No jnp.pad (it would be a full extra HBM pass over x): the last partial block is
    # run directly and garbage rows are masked in-kernel via `row < n_valid`.
    tgt_in = target.reshape(-1, 1).astype(jnp.int32)
    m_in = m_list.reshape(1, C)

    # NOTE: n_valid / tile_b are compile-time constants -> distinct B retraces.
    kernel = functools.partial(
        _elm_loss_kernel, s=float(s), lamda=float(lamda), n_valid=B, tile_b=tile_b
    )

    partials = pl.pallas_call(
        kernel,
        out_shape=jax.ShapeDtypeStruct((num_tiles * 8, 128), jnp.float32),
        grid=(num_tiles,),
        in_specs=[
            pl.BlockSpec((tile_b, C), lambda i: (i, 0)),   # x (native dtype)
            pl.BlockSpec((tile_b, 1), lambda i: (i, 0)),   # target ids
            pl.BlockSpec((1, C), lambda i: (0, 0)),        # class margins
        ],
        out_specs=pl.BlockSpec((8, 128), lambda i: (i, 0)),
        compiler_params=pltpu.CompilerParams(
            dimension_semantics=("parallel",),
            vmem_limit_bytes=vmem_budget,
        ),
    )(x, tgt_in, m_in)

    # finish the mean: one exact partial sum per tile lives at [tile*8, 0]
    total = jnp.sum(partials.reshape(num_tiles, 8, 128)[:, 0, 0])
    return total / B


def make_m_list(cls_num_list, max_m=0.5):
    """Deterministic margin list, mirroring ELMLoss.__init__."""
    m = 1.0 / jnp.sqrt(jnp.sqrt(cls_num_list.astype(jnp.float32)))
    m = m * (max_m / jnp.max(m))
    return m


def _reference_elm_loss(x, target, m_list, s=30.0, lamda=1.0):
    """Pure-JAX reference of the torch forward (sanity check)."""
    B, C = x.shape
    index = jax.nn.one_hot(target, C, dtype=jnp.bool_)
    x_masked = jnp.where(index, -1.0e8, x.astype(jnp.float32))
    runner = jnp.argmax(x_masked, axis=1)
    index2 = jax.nn.one_hot(runner, C, dtype=jnp.bool_)
    batch_m1 = (m_list[None, :] @ index.astype(jnp.float32).T).reshape(-1, 1)
    batch_m2 = (m_list[None, :] @ index2.astype(jnp.float32).T).reshape(-1, 1)
    x_m = x - batch_m1 + batch_m2 * lamda
    output = jnp.where(index, x_m, x)
    logits = s * output
    logp = jax.nn.log_softmax(logits, axis=1)
    return -jnp.mean(jnp.sum(jnp.where(index, logp, 0.0), axis=1))


if __name__ == "__main__":
    B, C = 8, 16
    key = jax.random.PRNGKey(0)
    kx, kt = jax.random.split(key)

    x = jax.random.normal(kx, (B, C), dtype=jnp.float32)
    target = jax.random.randint(kt, (B,), 0, C, dtype=jnp.int32)

    # deterministic synthetic class-count list (long-tailed-ish)
    cls_num_list = jnp.array(
        [1000.0 / (1.0 + 0.5 * i) for i in range(C)], dtype=jnp.float32
    )
    m_list = make_m_list(cls_num_list, max_m=0.5)

    loss = elm_loss(x, target, m_list, s=30.0, lamda=1.0)
    loss = jax.block_until_ready(loss)

    ref = _reference_elm_loss(x, target, m_list, s=30.0, lamda=1.0)
    assert jnp.allclose(loss, ref, rtol=1e-5, atol=1e-5), (loss, ref)

    print("KERNEL_OK")
</pallas_src>

<mosaic_0001>
module attributes {stable_mosaic.version = 11 : i64} {
  func.func @_elm_loss_kernel(%arg0: i32, %arg1: memref<8x16xf32, #tpu.memory_space<vmem>>, %arg2: memref<8x1xi32, #tpu.memory_space<vmem>>, %arg3: memref<1x16xf32, #tpu.memory_space<vmem>>, %arg4: memref<8x128xf32, #tpu.memory_space<vmem>>) attributes {dimension_semantics = [#tpu.dimension_semantics<parallel>], iteration_bounds = array<i64: 1>, scalar_prefetch = 0 : i64, scratch_operands = 0 : i64, tpu.core_type = #tpu.core_type<tc>, window_params = [{transform_indices = @transform_0, window_bounds = array<i64: 8, 16>}, {transform_indices = @transform_1, window_bounds = array<i64: 8, 1>}, {pipeline_mode = #tpu.pipeline_mode<synchronous>, transform_indices = @transform_2, window_bounds = array<i64: 1, 16>}, {transform_indices = @transform_3, window_bounds = array<i64: 8, 128>}]} {
    %c0 = arith.constant 0 : index
    %c0_0 = arith.constant 0 : index
    %0 = vector.load %arg1[%c0, %c0_0] : memref<8x16xf32, #tpu.memory_space<vmem>>, vector<8x16xf32>
    %c0_1 = arith.constant 0 : index
    %c0_2 = arith.constant 0 : index
    %1 = vector.load %arg2[%c0_1, %c0_2] : memref<8x1xi32, #tpu.memory_space<vmem>>, vector<8x1xi32>
    %c0_3 = arith.constant 0 : index
    %c0_4 = arith.constant 0 : index
    %2 = vector.load %arg3[%c0_3, %c0_4] : memref<1x16xf32, #tpu.memory_space<vmem>>, vector<1x16xf32>
    %3 = tpu.iota {dimensions = array<i32: 1>} : vector<8x16xi32>
    %4 = vector.broadcast %1 : vector<8x1xi32> to vector<8x16xi32>
    %5 = arith.cmpi eq, %3, %4 : vector<8x16xi32>
    %cst = arith.constant 0xFF800000 : f32
    %6 = vector.broadcast %cst : f32 to vector<8x16xf32>
    %7 = arith.select %5, %6, %0 : vector<8x16xi1>, vector<8x16xf32>
    %cst_5 = arith.constant dense<0xFF800000> : vector<8xf32>
    %8 = vector.multi_reduction <maximumf>, %7, %cst_5 [1] : vector<8x16xf32> to vector<8xf32>
    %9 = vector.shape_cast %8 : vector<8xf32> to vector<8x1xf32>
    %10 = vector.broadcast %9 : vector<8x1xf32> to vector<8x16xf32>
    %11 = arith.cmpf oeq, %7, %10 : vector<8x16xf32>
    %c16_i32 = arith.constant 16 : i32
    %12 = vector.broadcast %c16_i32 : i32 to vector<8x16xi32>
    %13 = arith.select %11, %3, %12 : vector<8x16xi1>, vector<8x16xi32>
    %cst_6 = arith.constant dense<2147483647> : vector<8xi32>
    %14 = vector.multi_reduction <minsi>, %13, %cst_6 [1] : vector<8x16xi32> to vector<8xi32>
    %15 = vector.shape_cast %14 : vector<8xi32> to vector<8x1xi32>
    %16 = vector.broadcast %15 : vector<8x1xi32> to vector<8x16xi32>
    %17 = arith.cmpi eq, %3, %16 : vector<8x16xi32>
    %18 = vector.broadcast %2 : vector<1x16xf32> to vector<8x16xf32>
    %19 = arith.subf %0, %18 : vector<8x16xf32>
    %cst_7 = arith.constant 0.000000e+00 : f32
    %20 = vector.broadcast %cst_7 : f32 to vector<8x16xf32>
    %21 = arith.select %5, %19, %20 : vector<8x16xi1>, vector<8x16xf32>
    %cst_8 = arith.constant 1.000000e+00 : f32
    %22 = vector.broadcast %cst_8 : f32 to vector<1x16xf32>
    %23 = arith.mulf %22, %2 : vector<1x16xf32>
    %cst_9 = arith.constant 0.000000e+00 : f32
    %24 = vector.shape_cast %23 : vector<1x16xf32> to vector<1x16xf32>
    %25 = vector.broadcast %24 : vector<1x16xf32> to vector<8x16xf32>
    %26 = vector.broadcast %cst_9 : f32 to vector<8x16xf32>
    %27 = arith.select %17, %25, %26 : vector<8x16xi1>, vector<8x16xf32>
    %28 = arith.addf %21, %27 : vector<8x16xf32>
    %cst_10 = arith.constant dense<0.000000e+00> : vector<8xf32>
    %29 = vector.multi_reduction <add>, %28, %cst_10 [1] : vector<8x16xf32> to vector<8xf32>
    %30 = vector.shape_cast %29 : vector<8xf32> to vector<8x1xf32>
    %cst_11 = arith.constant 3.000000e+01 : f32
    %31 = vector.broadcast %cst_11 : f32 to vector<8x1xf32>
    %32 = arith.mulf %31, %30 : vector<8x1xf32>
    %cst_12 = arith.constant 3.000000e+01 : f32
    %33 = vector.broadcast %cst_12 : f32 to vector<8x1xf32>
    %34 = arith.mulf %33, %9 : vector<8x1xf32>
    %35 = arith.maximumf %34, %32 : vector<8x1xf32>
    %cst_13 = arith.constant 3.000000e+01 : f32
    %36 = vector.broadcast %cst_13 : f32 to vector<8x16xf32>
    %37 = arith.mulf %36, %0 : vector<8x16xf32>
    %38 = vector.broadcast %35 : vector<8x1xf32> to vector<8x16xf32>
    %39 = arith.subf %37, %38 : vector<8x16xf32>
    %cst_14 = arith.constant 0xFF800000 : f32
    %40 = vector.broadcast %cst_14 : f32 to vector<8x16xf32>
    %41 = arith.select %5, %40, %39 : vector<8x16xi1>, vector<8x16xf32>
    %42 = math.exp %41 : vector<8x16xf32>
    %cst_15 = arith.constant dense<0.000000e+00> : vector<8xf32>
    %43 = vector.multi_reduction <add>, %42, %cst_15 [1] : vector<8x16xf32> to vector<8xf32>
    %44 = vector.shape_cast %43 : vector<8xf32> to vector<8x1xf32>
    %45 = arith.subf %32, %35 : vector<8x1xf32>
    %46 = math.exp %45 : vector<8x1xf32>
    %47 = arith.addf %44, %46 : vector<8x1xf32>
    %48 = math.log %47 : vector<8x1xf32>
    %49 = arith.addf %48, %35 : vector<8x1xf32>
    %50 = arith.subf %49, %32 : vector<8x1xf32>
    %c8_i32 = arith.constant 8 : i32
    %51 = arith.muli %arg0, %c8_i32 : i32
    %52 = tpu.iota {dimensions = array<i32: 0>} : vector<8x1xi32>
    %53 = vector.broadcast %51 : i32 to vector<8x1xi32>
    %54 = arith.addi %53, %52 : vector<8x1xi32>
    %c8_i32_16 = arith.constant 8 : i32
    %55 = vector.broadcast %c8_i32_16 : i32 to vector<8x1xi32>
    %56 = arith.cmpi slt, %54, %55 : vector<8x1xi32>
    %cst_17 = arith.constant 0.000000e+00 : f32
    %57 = vector.broadcast %cst_17 : f32 to vector<8x1xf32>
    %58 = arith.select %56, %50, %57 : vector<8x1xi1>, vector<8x1xf32>
    %cst_18 = arith.constant 0.000000e+00 : f32
    %59 = vector.broadcast %cst_18 : f32 to vector<8x128xf32>
    %60 = vector.shape_cast %58 : vector<8x1xf32> to vector<1x8x1xf32>
    %cst_19 = arith.constant dense<0.000000e+00> : vector<1xf32>
    %61 = vector.multi_reduction <add>, %60, %cst_19 [1, 2] : vector<1x8x1xf32> to vector<1xf32>
    %62 = vector.shape_cast %61 : vector<1xf32> to vector<1x1x1xf32>
    %63 = vector.extract %62[0, 0, 0] : f32 from vector<1x1x1xf32>
    %64 = vector.broadcast %63 : f32 to vector<8x128xf32>
    %65 = arith.addf %59, %64 : vector<8x128xf32>
    %c0_20 = arith.constant 0 : index
    %c0_21 = arith.constant 0 : index
    %66 = vector.load %arg4[%c0_20, %c0_21] : memref<8x128xf32, #tpu.memory_space<vmem>>, vector<8x128xf32>
    tpu.vector_store %arg4[%c0_20, %c0_21], %65 {strides = array<i32>} : memref<8x128xf32, #tpu.memory_space<vmem>>, vector<8x128xf32>,
    return
  }
  func.func @transform_0(%arg0: i32) -> (i32, i32) {
    %c0_i32 = arith.constant 0 : i32
    %c0_i32_0 = arith.constant 0 : i32
    return %arg0, %c0_i32 : i32, i32
  }
  func.func @transform_1(%arg0: i32) -> (i32, i32) {
    %c0_i32 = arith.constant 0 : i32
    %c0_i32_0 = arith.constant 0 : i32
    return %arg0, %c0_i32 : i32, i32
  }
  func.func @transform_2(%arg0: i32) -> (i32, i32) {
    %c0_i32 = arith.constant 0 : i32
    %c0_i32_0 = arith.constant 0 : i32
    %c0_i32_1 = arith.constant 0 : i32
    return %c0_i32, %c0_i32_0 : i32, i32
  }
  func.func @transform_3(%arg0: i32) -> (i32, i32) {
    %c0_i32 = arith.constant 0 : i32
    %c0_i32_0 = arith.constant 0 : i32
    return %arg0, %c0_i32 : i32, i32
  }
}

</mosaic_0001>

<bundles_post_ra>
// kernel: tpu_custom_call.1
= control target key start
LH: loop header
LB: loop body
LE: loop exit
PB: predicated region body
PF: predicated region fallthrough
CT: control target
= control target key end

     0   :  { %s192_s0 = inlined_call_operand.vmem [shape: f32[8,16], index: 0, kind: input, shape index: {}]   ;;  %s193_s1 = inlined_call_operand.vmem [shape: s32[8,1], index: 1, kind: input, shape index: {}]   ;;  %s194_s2 = inlined_call_operand.vmem [shape: f32[1,16], index: 2, kind: input, shape index: {}]   ;;  %s195_s3 = inlined_call_operand.hbm [shape: f32[8,128], index: 3, kind: output, shape index: {}]  }
   0x1   :  { %v16_v0 = vld [vmem:[%s193_s1] sm:$0xff] }
   0x2   :  { %8 = vsyncpa [#allocation3], 0  ;;  %v151_v1 = vmov 0   ;;  %v18_v2 = vlaneseq  ;;  %vm25_vm0 = vcmask 130048   ;;  %v15_v5 = vld [vmem:[%s192_s0] sm:$0xff]  ;;  %vm83_vm5 = vcmask 7168  }
   0x3   :  { %117 = vset.pattern.permute.xlu0 %v151_v1  ;;  %v118_v18 = vld [vmem:[%s194_s2] ss:$0 sm:$0xff]  ;;  %v60_v29 = vmul.f32 30.0, %v15_v5  ;;  %s152_s2 = smov [#allocation2]   ;;  %s104_s19 = sshll.u32 %s195_s3, 4  ;;  %s105_s19 = int_to_ptr.hbm [resolvable:$true] %s104_s19 }
   0x4   :  { %21 = vperm.xlu0 %117, %v16_v0   ;;  %v19_v3 = vand.u32 127, %v18_v2  ;;  %v50_v22 = vsub.f32 %v15_v5, %v118_v18  ;;  %s102_s16 = sshll.u32 %s152_s2, 4  ;;  %s103_s16 = int_to_ptr.vmem [resolvable:$true] %s102_s16 }
  0x76   :  { %v22_v4 = vpop.permute.xlu0 %21 }
  0x77   :  { %vm23_vm1 = vcmp.eq.s32.totalorder %v19_v3, %v22_v4 }
  0x78   :  { %v24_v6 = vsel %vm23_vm1, -inf, %v15_v5  ;;  %v51_v24 = vsel %vm23_vm1, %v50_v22, 0.0 }
  0x79   :  { %v26_v7 = vsel %vm25_vm0, %v24_v6, -inf }
  0x7a   :  { %27 = vmax.xlane.f32.xlu0 %v26_v7 }
  0xed   :  { %v28_v8 = vpop.xlane.xlu0 %27 }
  0xee   :  { %vm29_vm2 = vcmp.eq.f32.partialorder %v24_v6, %v28_v8  ;;  %v58_v30 = vmul.f32 30.0, %v28_v8 }
  0xef   :  { %v30_v9 = vsel %vm29_vm2, %v19_v3, 16 }
  0xf0   :  { %v31_v10 = vsel %vm25_vm0, %v30_v9, 2147483647 }
  0xf1   :  { %v33_v11 = vshra.s32 %v31_v10, 16  ;;  %v32_v13 = vand.u32 65535, %v31_v10 }
  0xf3   :  { %v35_v12 = vcvt.s32.f32 %v33_v11  ;;  %v34_v15 = vcvt.s32.f32 %v32_v13 }
  0xf5   :  { %36 = vmin.xlane.f32.xlu1 %v35_v12 }
 0x168   :  { %v37_v14 = vpop.xlane.xlu1 %36 }
 0x169   :  { %vm38_vm3 = vcmp.eq.f32.partialorder %v35_v12, %v37_v14  ;;  %v43_v17 = vcvt.f32.s32 %v37_v14 }
 0x16a   :  { %v39_v16 = vsel %vm38_vm3, %v34_v15, inf }
 0x16b   :  { %40 = vmin.xlane.f32.xlu1 %v39_v16  ;;  %v44_v20 = vshll.u32 %v43_v17, 16 }
 0x1de   :  { %v41_v19 = vpop.xlane.xlu1 %40 }
 0x1df   :  { %v42_v21 = vcvt.f32.s32 %v41_v19 }
 0x1e1   :  { %v45_v23 = vadd.s32 %v44_v20, %v42_v21 }
 0x1e3   :  { %vm46_vm4 = vcmp.eq.s32.totalorder %v19_v3, %v45_v23 }
 0x1e4   :  { %v52_v25 = vsel %vm46_vm4, %v118_v18, 0.0 }
 0x1e5   :  { %v53_v26 = vadd.f32 %v52_v25, %v51_v24 }
 0x1e7   :  { %v54_v27 = vsel %vm25_vm0, %v53_v26, 0.0 }
 0x1e8   :  { %55 = vadd.xlane.f32.xlu2 %v54_v27 }
 0x25b   :  { %v56_v28 = vpop.xlane.xlu2 %55 }
 0x25c   :  { %v57_v31 = vmul.f32 30.0, %v56_v28 }
 0x25e   :  { %v59_v32 = vmax.f32 %v58_v30, %v57_v31 }
 0x260   :  { %v61_v33 = vsub.f32 %v60_v29, %v59_v32  ;;  %v68_v38 = vsub.f32 %v57_v31, %v59_v32 }
 0x262   :  { %v62_v34 = vsel %vm23_vm1, -inf, %v61_v33  ;;  %v69_v39 = vmul.f32 1.442695, %v68_v38 }
 0x263   :  { %v63_v35 = vmul.f32 1.442695, %v62_v34 }
 0x265   :  { %119 = vpow2.f32 %v63_v35 }
 0x266   :  { %121 = vpow2.f32 %v69_v39 }
 0x26b   :  { %v120_v36 = vpop.eup %119 }
 0x26c   :  { %v65_v37 = vsel %vm25_vm0, %v120_v36, 0.0  ;;  %v122_v40 = vpop.eup %121 }
 0x26d   :  { %66 = vadd.xlane.f32.xlu2 %v65_v37 }
 0x2e0   :  { %v67_v41 = vpop.xlane.xlu2 %66 }
 0x2e1   :  { %v71_v42 = vadd.f32 %v122_v40, %v67_v41 }
 0x2e3   :  { %123 = vlog2.f32 %v71_v42 }
 0x2e9   :  { %v124_v43 = vpop.eup %123 }
 0x2ea   :  { %v73_v44 = vmul.f32 0.6931472, %v124_v43 }
 0x2ec   :  { %v74_v45 = vadd.f32 %v73_v44, %v59_v32 }
 0x2ee   :  { %v75_v46 = vsub.f32 %v74_v45, %v57_v31 }
 0x2f0   :  { %v84_v47 = vsel %vm83_vm5, %v75_v46, 0.0 }
 0x2f1   :  { %85 = vadd.xlane.f32.xlu1 %v84_v47 }
 0x364   :  { %v86_v48 = vpop.xlane.xlu1 %85 }
 0x365   :  { %v87_v49 = vrot.slane %v86_v48, 4 }
 0x367   :  { %v88_v50 = vadd.f32 %v87_v49, %v86_v48 }
 0x369   :  { %v89_v51 = vrot.slane %v88_v50, 2 }
 0x36b   :  { %v90_v52 = vadd.f32 %v89_v51, %v88_v50 }
 0x36d   :  { %v91_v53 = vrot.slane %v90_v52, 1 }
 0x36f   :  { %v92_v54 = vadd.f32 %v91_v53, %v90_v52 }
 0x371   :  { %113 = vpush %v92_v54 }
 0x3a2   :  { %s114_s20 = spop %113 }
 0x3a3   :  { %v94_v55 = vstv %s114_s20 }
 0x3a4   :  { %96 = vst [vmem:[#allocation2] sm:$0xff] %v94_v55 }
 0x3a5   :  { %107 = dma.vmem_to_hbm [thread:$0]  %s103_s16, 128, %s105_s19, [#allocation3]  }
 0x3a6   :  { %149 = dma.done.wait [#allocation3], 128  }
 0x3a7   :  { %150 = vsyncadd [#allocation3], 4294967168 }
 0x3a8   :  { %112 = vsyncpa [#allocation3], 1 }

</bundles_post_ra>
